<compile_context>
chip_gen: v5e
topology: v5e:2x2
jax: 0.10.0
libtpu: 0.0.40
codegen_flags: <defaults>
</compile_context>

<pallas_src>
import functools

import jax
import jax.numpy as jnp
from jax import lax
from jax.experimental import pallas as pl
from jax.experimental.pallas import tpu as pltpu

LANE = 128
TM_TARGET = 512          # output rows per grid step (review target: 512-2048)


def _round_up(v, m):
    return (v + m - 1) // m * m


def _largest_divisor_tile(total, candidates=(512, 256, 128)):
    """Largest candidate tile that divides `total` (total is a multiple of 128)."""
    for c in candidates:
        if total % c == 0:
            return c
    return 128


def _gemm_kernel(a_ref, b_ref, o_ref, acc_ref):
    """One (m-tile, n-tile, k-tile) step of a tiled matmul with f32 accumulation.

    a_ref:   (TM, TK)  im2col rows (compute dtype, lane-dense)
    b_ref:   (TK, TN)  flat weight slab (compute dtype, lane-dense)
    o_ref:   (TM, TN)  f32 output tile (lane-dense stores)
    acc_ref: (TM, TN)  f32 VMEM accumulator (persists across the k axis)
    """
    @pl.when(pl.program_id(2) == 0)
    def _():
        acc_ref[...] = jnp.zeros_like(acc_ref)

    acc_ref[...] += jnp.dot(a_ref[...], b_ref[...],
                            preferred_element_type=jnp.float32)

    @pl.when(pl.program_id(2) == pl.num_programs(2) - 1)
    def _():
        o_ref[...] = acc_ref[...].astype(o_ref.dtype)


def conv2d_c_module(x_nchw, w_oihw, stride=1, *, compute_dtype=jnp.bfloat16):
    """Forward pass of module C: conv2d(x, w, stride, pad=(k-1)//2), no bias.

    x_nchw: (N, Cin, H, W); w_oihw: (Cout, Cin, K, K)  ->  (N, Cout, Ho, Wo) NCHW.
    """
    N, Cin, H, W = x_nchw.shape
    Cout, Cin_w, K, K2 = w_oihw.shape
    assert Cin == Cin_w and K == K2
    pad = (K - 1) // 2
    Ho = (H + 2 * pad - K) // stride + 1
    Wo = (W + 2 * pad - K) // stride + 1

    KKC = K * K * Cin                      # true contraction length
    Kc = _round_up(KKC, LANE)              # lane-padded contraction (taps packed)
    Cout_p = _round_up(Cout, LANE)         # lane-dense output stores
    M = N * Ho * Wo                        # output pixels = GEMM rows

    # ---- wrapper: layout plumbing only (no FLOPs). Lane-dense im2col slab with
    # taps packed along the lane dim: col[m, (kh*K+kw)*Cin + ci].
    x_nhwc = jnp.transpose(x_nchw, (0, 2, 3, 1)).astype(compute_dtype)
    x_pad = jnp.pad(x_nhwc, ((0, 0), (pad, pad), (pad, pad), (0, 0)))
    taps = []
    for kh in range(K):
        for kw in range(K):
            taps.append(
                x_pad[:, kh:kh + (Ho - 1) * stride + 1:stride,
                         kw:kw + (Wo - 1) * stride + 1:stride, :])
    col = jnp.concatenate(taps, axis=-1).reshape(M, KKC)

    TM = min(TM_TARGET, _round_up(M, 8))   # big output tile; sublane-aligned
    M_p = _round_up(M, TM)
    col = jnp.pad(col, ((0, M_p - M), (0, Kc - KKC)))

    # Weight slab (Kc, Cout_p), rows ordered (kh, kw, ci) to match `col`.
    w_flat = jnp.transpose(w_oihw, (2, 3, 1, 0)).reshape(KKC, Cout)
    w_flat = jnp.pad(w_flat, ((0, Kc - KKC), (0, Cout_p - Cout)))
    w_flat = w_flat.astype(compute_dtype)

    TN = _largest_divisor_tile(Cout_p)     # >=256 when possible (v6e/v7x MXU width)
    TK = _largest_divisor_tile(Kc)

    grid = (M_p // TM, Cout_p // TN, Kc // TK)

    out = pl.pallas_call(
        _gemm_kernel,
        out_shape=jax.ShapeDtypeStruct((M_p, Cout_p), jnp.float32),
        grid=grid,
        in_specs=[
            pl.BlockSpec((TM, TK), lambda i, j, k: (i, k)),
            # Weight block index is constant over i; its tile is tiny (<=512 KiB).
            # TODO(synk): single-buffer it (pipeline_mode=pl.Buffered(1)) once we
            # want to reclaim the duplicate buffer for even larger TM.
            pl.BlockSpec((TK, TN), lambda i, j, k: (k, j)),
        ],
        out_specs=pl.BlockSpec((TM, TN), lambda i, j, k: (i, j)),
        scratch_shapes=[pltpu.VMEM((TM, TN), jnp.float32)],
        compiler_params=pltpu.CompilerParams(
            dimension_semantics=("parallel", "parallel", "arbitrary")),
    )(col, w_flat)

    out = out[:M, :Cout].reshape(N, Ho, Wo, Cout)
    return jnp.transpose(out, (0, 3, 1, 2)).astype(x_nchw.dtype)


if __name__ == "__main__":
    # Small shapes consistent with the module: C(nIn=4, nOut=8, kSize=3, stride=1)
    N, Cin, H, W = 2, 4, 16, 16
    Cout, K, stride = 8, 3, 1
    pad = (K - 1) // 2

    key = jax.random.PRNGKey(0)
    kx, kw = jax.random.split(key)

    x = jax.random.normal(kx, (N, Cin, H, W), dtype=jnp.float32)
    fan_in = Cin * K * K
    bound = 1.0 / float(jnp.sqrt(fan_in))
    w = jax.random.uniform(kw, (Cout, Cin, K, K), dtype=jnp.float32,
                           minval=-bound, maxval=bound)

    conv = jax.jit(functools.partial(conv2d_c_module, stride=stride))
    out = jax.block_until_ready(conv(x, w))

    # Reference with identical bf16-cast inputs and f32 accumulation (matches the
    # kernel's MXU math); PyTorch f32 semantics differ only by the bf16 input cast.
    ref = lax.conv_general_dilated(
        x.astype(jnp.bfloat16), w.astype(jnp.bfloat16),
        window_strides=(stride, stride),
        padding=[(pad, pad), (pad, pad)],
        dimension_numbers=("NCHW", "OIHW", "NCHW"),
        preferred_element_type=jnp.float32,
    )

    Ho = (H + 2 * pad - K) // stride + 1
    Wo = (W + 2 * pad - K) // stride + 1
    assert out.shape == (N, Cout, Ho, Wo), out.shape
    assert out.dtype == jnp.float32
    err = float(jnp.max(jnp.abs(out - ref)))
    assert jnp.allclose(out, ref, atol=1e-2, rtol=1e-2), err

    print("KERNEL_OK")
</pallas_src>

<mosaic_0001>
module attributes {stable_mosaic.version = 11 : i64} {
  func.func @_gemm_kernel(%arg0: i32, %arg1: i32, %arg2: i32, %arg3: memref<512x128xbf16, #tpu.memory_space<vmem>>, %arg4: memref<128x128xbf16, #tpu.memory_space<vmem>>, %arg5: memref<512x128xf32, #tpu.memory_space<vmem>>, %arg6: memref<512x128xf32, #tpu.memory_space<vmem>>) attributes {dimension_semantics = [#tpu.dimension_semantics<parallel>, #tpu.dimension_semantics<parallel>, #tpu.dimension_semantics<arbitrary>], iteration_bounds = array<i64: 1, 1, 1>, scalar_prefetch = 0 : i64, scratch_operands = 1 : i64, tpu.core_type = #tpu.core_type<tc>, window_params = [{transform_indices = @transform_0, window_bounds = array<i64: 512, 128>}, {transform_indices = @transform_1, window_bounds = array<i64: 128, 128>}, {transform_indices = @transform_2, window_bounds = array<i64: 512, 128>}]} {
    %c0_i32 = arith.constant 0 : i32
    %0 = arith.cmpi eq, %arg2, %c0_i32 : i32
    %1 = arith.extui %0 : i1 to i32
    %c0_i32_0 = arith.constant 0 : i32
    %2 = arith.cmpi ne, %1, %c0_i32_0 : i32
    scf.if %2 {
      %cst_10 = arith.constant 0.000000e+00 : f32
      %12 = vector.broadcast %cst_10 : f32 to vector<512x128xf32>
      %c0_11 = arith.constant 0 : index
      %c0_12 = arith.constant 0 : index
      %13 = vector.load %arg6[%c0_11, %c0_12] : memref<512x128xf32, #tpu.memory_space<vmem>>, vector<512x128xf32>
      tpu.vector_store %arg6[%c0_11, %c0_12], %12 {strides = array<i32>} : memref<512x128xf32, #tpu.memory_space<vmem>>, vector<512x128xf32>,
    } else {
    }
    %c0 = arith.constant 0 : index
    %c0_1 = arith.constant 0 : index
    %3 = vector.load %arg6[%c0, %c0_1] : memref<512x128xf32, #tpu.memory_space<vmem>>, vector<512x128xf32>
    %c0_2 = arith.constant 0 : index
    %c0_3 = arith.constant 0 : index
    %4 = vector.load %arg3[%c0_2, %c0_3] : memref<512x128xbf16, #tpu.memory_space<vmem>>, vector<512x128xbf16>
    %c0_4 = arith.constant 0 : index
    %c0_5 = arith.constant 0 : index
    %5 = vector.load %arg4[%c0_4, %c0_5] : memref<128x128xbf16, #tpu.memory_space<vmem>>, vector<128x128xbf16>
    %cst = arith.constant dense<0.000000e+00> : vector<512x128xf32>
    %6 = tpu.matmul %4, %5, %cst {dimension_numbers = #tpu.dot_dimension_numbers<[1], [0], [0], [1], [0, 0, 1, 1], [], []>} : vector<512x128xbf16>, vector<128x128xbf16>, vector<512x128xf32> -> vector<512x128xf32>
    %7 = arith.addf %3, %6 : vector<512x128xf32>
    %c0_6 = arith.constant 0 : index
    %c0_7 = arith.constant 0 : index
    %8 = vector.load %arg6[%c0_6, %c0_7] : memref<512x128xf32, #tpu.memory_space<vmem>>, vector<512x128xf32>
    tpu.vector_store %arg6[%c0_6, %c0_7], %7 {strides = array<i32>} : memref<512x128xf32, #tpu.memory_space<vmem>>, vector<512x128xf32>,
    %c0_i32_8 = arith.constant 0 : i32
    %9 = arith.cmpi eq, %arg2, %c0_i32_8 : i32
    %10 = arith.extui %9 : i1 to i32
    %c0_i32_9 = arith.constant 0 : i32
    %11 = arith.cmpi ne, %10, %c0_i32_9 : i32
    scf.if %11 {
      %c0_10 = arith.constant 0 : index
      %c0_11 = arith.constant 0 : index
      %12 = vector.load %arg6[%c0_10, %c0_11] : memref<512x128xf32, #tpu.memory_space<vmem>>, vector<512x128xf32>
      %c0_12 = arith.constant 0 : index
      %c0_13 = arith.constant 0 : index
      %13 = vector.load %arg5[%c0_12, %c0_13] : memref<512x128xf32, #tpu.memory_space<vmem>>, vector<512x128xf32>
      tpu.vector_store %arg5[%c0_12, %c0_13], %12 {strides = array<i32>} : memref<512x128xf32, #tpu.memory_space<vmem>>, vector<512x128xf32>,
    } else {
    }
    return
  }
  func.func @transform_0(%arg0: i32, %arg1: i32, %arg2: i32) -> (i32, i32) {
    %c0_i32 = arith.constant 0 : i32
    return %arg0, %arg2 : i32, i32
  }
  func.func @transform_1(%arg0: i32, %arg1: i32, %arg2: i32) -> (i32, i32) {
    %c0_i32 = arith.constant 0 : i32
    return %arg2, %arg1 : i32, i32
  }
  func.func @transform_2(%arg0: i32, %arg1: i32, %arg2: i32) -> (i32, i32) {
    %c0_i32 = arith.constant 0 : i32
    return %arg0, %arg1 : i32, i32
  }
}

</mosaic_0001>

<bundles_post_ra>
// kernel: conv2d_c_module.1
= control target key start
LH: loop header
LB: loop body
LE: loop exit
PB: predicated region body
PF: predicated region fallthrough
CT: control target
= control target key end

     0   :  { %s1446_s1 = inlined_call_operand.vmem [shape: bf16[128,128], index: 1, kind: input, shape index: {}]   ;;  %s1447_s0 = inlined_call_operand.vmem [shape: bf16[512,128], index: 0, kind: input, shape index: {}]   ;;  %s1448_s2 = inlined_call_operand.vmem [shape: f32[512,128], index: 2, kind: output, shape index: {}]  }
   0x1   :  { %v1094_v0 = vld [vmem:[%s1446_s1 + $0x38] sm:$0xff]  ;;  %v1093_v1 = vld [vmem:[%s1446_s1 + $0x30] sm:$0xff]  ;;  %v1092_v2 = vld [vmem:[%s1446_s1 + $0x28] sm:$0xff] }
   0x2   :  { %463 = vmatpush.bf16.msra.mxu0 %v1094_v0  ;;  %1095 = vmatpush.bf16.msra.mxu1 %v1094_v0  ;;  %v1091_v3 = vld [vmem:[%s1446_s1 + $0x20] sm:$0xff]  ;;  %v1090_v4 = vld [vmem:[%s1446_s1 + $0x18] sm:$0xff]  ;;  %v1089_v5 = vld [vmem:[%s1446_s1 + $0x10] sm:$0xff] }
   0x3   :  { %1096 = vmatpush.bf16.msra.mxu2 %v1094_v0  ;;  %1097 = vmatpush.bf16.msra.mxu3 %v1094_v0  ;;  %v1088_v6 = vld [vmem:[%s1446_s1 + $0x8] sm:$0xff]  ;;  %v1087_v7 = vld [vmem:[%s1446_s1] sm:$0xff]  ;;  %v1057_v16 = vld [vmem:[%s1447_s0 + $0x10] sm:$0xff] }
   0x4   :  { %v1055_v8 = vld [vmem:[%s1447_s0] sm:$0xff]  ;;  %v1056_v12 = vld [vmem:[%s1447_s0 + $0x8] sm:$0xff]  ;;  %v1065_v17 = vld [vmem:[%s1447_s0 + $0x50] sm:$0xff] }
   0x5   :  { %v1063_v9 = vld [vmem:[%s1447_s0 + $0x40] sm:$0xff]  ;;  %v1064_v13 = vld [vmem:[%s1447_s0 + $0x48] sm:$0xff]  ;;  %v1073_v18 = vld [vmem:[%s1447_s0 + $0x90] sm:$0xff] }
   0x6   :  { %464 = vmatpush.bf16.msra.mxu0 %v1093_v1  ;;  %1098 = vmatpush.bf16.msra.mxu1 %v1093_v1  ;;  %v1071_v10 = vld [vmem:[%s1447_s0 + $0x80] sm:$0xff]  ;;  %v1072_v14 = vld [vmem:[%s1447_s0 + $0x88] sm:$0xff]  ;;  %v1081_v19 = vld [vmem:[%s1447_s0 + $0xd0] sm:$0xff] }
   0x7   :  { %1099 = vmatpush.bf16.msra.mxu2 %v1093_v1  ;;  %1100 = vmatpush.bf16.msra.mxu3 %v1093_v1  ;;  %v1079_v11 = vld [vmem:[%s1447_s0 + $0xc0] sm:$0xff]  ;;  %v1080_v15 = vld [vmem:[%s1447_s0 + $0xc8] sm:$0xff]  ;;  %v1058_v20 = vld [vmem:[%s1447_s0 + $0x18] sm:$0xff] }
   0x8   :  { %v1066_v21 = vld [vmem:[%s1447_s0 + $0x58] sm:$0xff]  ;;  %v1059_v24 = vld [vmem:[%s1447_s0 + $0x20] sm:$0xff]  ;;  %v1060_v28 = vld [vmem:[%s1447_s0 + $0x28] sm:$0xff] }
   0x9   :  { %v1074_v22 = vld [vmem:[%s1447_s0 + $0x98] sm:$0xff]  ;;  %v1067_v25 = vld [vmem:[%s1447_s0 + $0x60] sm:$0xff]  ;;  %v1068_v29 = vld [vmem:[%s1447_s0 + $0x68] sm:$0xff] }
   0xa   :  { %465 = vmatpush.bf16.msra.mxu0 %v1092_v2  ;;  %1101 = vmatpush.bf16.msra.mxu1 %v1092_v2  ;;  %v1082_v23 = vld [vmem:[%s1447_s0 + $0xd8] sm:$0xff]  ;;  %v1075_v26 = vld [vmem:[%s1447_s0 + $0xa0] sm:$0xff]  ;;  %v1076_v30 = vld [vmem:[%s1447_s0 + $0xa8] sm:$0xff] }
   0xb   :  { %1102 = vmatpush.bf16.msra.mxu2 %v1092_v2  ;;  %1103 = vmatpush.bf16.msra.mxu3 %v1092_v2  ;;  %v1083_v27 = vld [vmem:[%s1447_s0 + $0xe0] sm:$0xff]  ;;  %v1084_v31 = vld [vmem:[%s1447_s0 + $0xe8] sm:$0xff]  ;;  %v1061_v32 = vld [vmem:[%s1447_s0 + $0x30] sm:$0xff] }
   0xc   :  { %v1069_v33 = vld [vmem:[%s1447_s0 + $0x70] sm:$0xff]  ;;  %v1062_v36 = vld [vmem:[%s1447_s0 + $0x38] sm:$0xff] }
   0xd   :  { %v1077_v34 = vld [vmem:[%s1447_s0 + $0xb0] sm:$0xff]  ;;  %v1070_v37 = vld [vmem:[%s1447_s0 + $0x78] sm:$0xff] }
   0xe   :  { %466 = vmatpush.bf16.msra.mxu0 %v1091_v3  ;;  %1104 = vmatpush.bf16.msra.mxu1 %v1091_v3  ;;  %v1085_v35 = vld [vmem:[%s1447_s0 + $0xf0] sm:$0xff]  ;;  %v1078_v38 = vld [vmem:[%s1447_s0 + $0xb8] sm:$0xff] }
   0xf   :  { %1105 = vmatpush.bf16.msra.mxu2 %v1091_v3  ;;  %1106 = vmatpush.bf16.msra.mxu3 %v1091_v3  ;;  %v1086_v39 = vld [vmem:[%s1447_s0 + $0xf8] sm:$0xff] }
  0x12   :  { %467 = vmatpush.bf16.msra.mxu0 %v1090_v4  ;;  %1107 = vmatpush.bf16.msra.mxu1 %v1090_v4 }
  0x13   :  { %1108 = vmatpush.bf16.msra.mxu2 %v1090_v4  ;;  %1109 = vmatpush.bf16.msra.mxu3 %v1090_v4 }
  0x16   :  { %468 = vmatpush.bf16.msra.mxu0 %v1089_v5  ;;  %1110 = vmatpush.bf16.msra.mxu1 %v1089_v5 }
  0x17   :  { %1111 = vmatpush.bf16.msra.mxu2 %v1089_v5  ;;  %1112 = vmatpush.bf16.msra.mxu3 %v1089_v5 }
  0x1a   :  { %469 = vmatpush.bf16.msra.mxu0 %v1088_v6  ;;  %1113 = vmatpush.bf16.msra.mxu1 %v1088_v6 }
  0x1b   :  { %1114 = vmatpush.bf16.msra.mxu2 %v1088_v6  ;;  %1115 = vmatpush.bf16.msra.mxu3 %v1088_v6 }
  0x1e   :  { %470 = vmatpush.bf16.msra.mxu0 %v1087_v7  ;;  %1116 = vmatpush.bf16.msra.mxu1 %v1087_v7 }
  0x1f   :  { %1117 = vmatpush.bf16.msra.mxu2 %v1087_v7  ;;  %1118 = vmatpush.bf16.msra.mxu3 %v1087_v7 }
  0x21   :  { %471 = vmatmul.bf16.vlgmr.msra.gmra.mxu0 %v1055_v8  ;;  %511 = vmatmul.bf16.vlgmr.msra.gmra.mxu1 %v1063_v9 }
  0x22   :  { %551 = vmatmul.bf16.vlgmr.msra.gmra.mxu2 %v1071_v10  ;;  %591 = vmatmul.bf16.vlgmr.msra.gmra.mxu3 %v1079_v11 }
  0x31   :  { %476 = vmatmul.bf16.gmra.mxu0 %v1056_v12  ;;  %516 = vmatmul.bf16.gmra.mxu1 %v1064_v13 }
  0x32   :  { %556 = vmatmul.bf16.gmra.mxu2 %v1072_v14  ;;  %596 = vmatmul.bf16.gmra.mxu3 %v1080_v15 }
  0x41   :  { %481 = vmatmul.bf16.gmra.mxu0 %v1057_v16  ;;  %521 = vmatmul.bf16.gmra.mxu1 %v1065_v17 }
  0x42   :  { %561 = vmatmul.bf16.gmra.mxu2 %v1073_v18  ;;  %601 = vmatmul.bf16.gmra.mxu3 %v1081_v19 }
  0x51   :  { %486 = vmatmul.bf16.gmra.mxu0 %v1058_v20  ;;  %526 = vmatmul.bf16.gmra.mxu1 %v1066_v21 }
  0x52   :  { %566 = vmatmul.bf16.gmra.mxu2 %v1074_v22  ;;  %606 = vmatmul.bf16.gmra.mxu3 %v1082_v23 }
  0x61   :  { %491 = vmatmul.bf16.gmra.mxu0 %v1059_v24  ;;  %531 = vmatmul.bf16.gmra.mxu1 %v1067_v25 }
  0x62   :  { %571 = vmatmul.bf16.gmra.mxu2 %v1075_v26  ;;  %611 = vmatmul.bf16.gmra.mxu3 %v1083_v27 }
  0x71   :  { %496 = vmatmul.bf16.gmra.mxu0 %v1060_v28  ;;  %536 = vmatmul.bf16.gmra.mxu1 %v1068_v29 }
  0x72   :  { %576 = vmatmul.bf16.gmra.mxu2 %v1076_v30  ;;  %616 = vmatmul.bf16.gmra.mxu3 %v1084_v31 }
  0x81   :  { %501 = vmatmul.bf16.gmra.mxu0 %v1061_v32  ;;  %541 = vmatmul.bf16.gmra.mxu1 %v1069_v33 }
  0x82   :  { %581 = vmatmul.bf16.gmra.mxu2 %v1077_v34  ;;  %621 = vmatmul.bf16.gmra.mxu3 %v1085_v35 }
  0x91   :  { %506 = vmatmul.bf16.gmra.mxu0 %v1062_v36  ;;  %546 = vmatmul.bf16.gmra.mxu1 %v1070_v37 }
  0x92   :  { %586 = vmatmul.bf16.gmra.mxu2 %v1078_v38  ;;  %626 = vmatmul.bf16.gmra.mxu3 %v1086_v39 }
  0x9e   :  { %v472_v40 = vpop.f32.mrf.mxu0  ;;  %v512_v41 = vpop.f32.mrf.mxu1 }
  0x9f   :  { %827 = vst [vmem:[%s1448_s2] sm:$0xff] %v472_v40 }
  0xa0   :  { %843 = vst [vmem:[%s1448_s2 + $0x80] sm:$0xff] %v512_v41 }
  0xa5   :  { %v552_v42 = vpop.f32.mrf.mxu2  ;;  %v592_v43 = vpop.f32.mrf.mxu3 }
  0xa6   :  { %859 = vst [vmem:[%s1448_s2 + $0x100] sm:$0xff] %v552_v42  ;;  %v474_v44 = vpop.f32.mrf.mxu0  ;;  %v514_v45 = vpop.f32.mrf.mxu1 }
  0xa7   :  { %875 = vst [vmem:[%s1448_s2 + $0x180] sm:$0xff] %v592_v43 }
  0xa8   :  { %828 = vst [vmem:[%s1448_s2 + $0x8] sm:$0xff] %v474_v44 }
  0xa9   :  { %844 = vst [vmem:[%s1448_s2 + $0x88] sm:$0xff] %v514_v45 }
  0xad   :  { %v554_v46 = vpop.f32.mrf.mxu2  ;;  %v594_v47 = vpop.f32.mrf.mxu3 }
  0xae   :  { %860 = vst [vmem:[%s1448_s2 + $0x108] sm:$0xff] %v554_v46  ;;  %v477_v48 = vpop.f32.mrf.mxu0  ;;  %v517_v49 = vpop.f32.mrf.mxu1 }
  0xaf   :  { %876 = vst [vmem:[%s1448_s2 + $0x188] sm:$0xff] %v594_v47 }
  0xb0   :  { %829 = vst [vmem:[%s1448_s2 + $0x10] sm:$0xff] %v477_v48 }
  0xb1   :  { %845 = vst [vmem:[%s1448_s2 + $0x90] sm:$0xff] %v517_v49 }
  0xb5   :  { %v557_v50 = vpop.f32.mrf.mxu2  ;;  %v597_v51 = vpop.f32.mrf.mxu3 }
  0xb6   :  { %861 = vst [vmem:[%s1448_s2 + $0x110] sm:$0xff] %v557_v50  ;;  %v479_v52 = vpop.f32.mrf.mxu0  ;;  %v519_v53 = vpop.f32.mrf.mxu1 }
  0xb7   :  { %877 = vst [vmem:[%s1448_s2 + $0x190] sm:$0xff] %v597_v51 }
  0xb8   :  { %830 = vst [vmem:[%s1448_s2 + $0x18] sm:$0xff] %v479_v52 }
  0xb9   :  { %846 = vst [vmem:[%s1448_s2 + $0x98] sm:$0xff] %v519_v53 }
  0xbd   :  { %v559_v54 = vpop.f32.mrf.mxu2  ;;  %v599_v55 = vpop.f32.mrf.mxu3 }
  0xbe   :  { %862 = vst [vmem:[%s1448_s2 + $0x118] sm:$0xff] %v559_v54  ;;  %v482_v56 = vpop.f32.mrf.mxu0  ;;  %v522_v57 = vpop.f32.mrf.mxu1 }
  0xbf   :  { %878 = vst [vmem:[%s1448_s2 + $0x198] sm:$0xff] %v599_v55 }
  0xc0   :  { %831 = vst [vmem:[%s1448_s2 + $0x20] sm:$0xff] %v482_v56 }
  0xc1   :  { %847 = vst [vmem:[%s1448_s2 + $0xa0] sm:$0xff] %v522_v57 }
  0xc5   :  { %v562_v58 = vpop.f32.mrf.mxu2  ;;  %v602_v59 = vpop.f32.mrf.mxu3 }
  0xc6   :  { %863 = vst [vmem:[%s1448_s2 + $0x120] sm:$0xff] %v562_v58  ;;  %v484_v60 = vpop.f32.mrf.mxu0  ;;  %v524_v61 = vpop.f32.mrf.mxu1 }
  0xc7   :  { %879 = vst [vmem:[%s1448_s2 + $0x1a0] sm:$0xff] %v602_v59 }
  0xc8   :  { %832 = vst [vmem:[%s1448_s2 + $0x28] sm:$0xff] %v484_v60 }
  0xc9   :  { %848 = vst [vmem:[%s1448_s2 + $0xa8] sm:$0xff] %v524_v61 }
  0xcd   :  { %v564_v62 = vpop.f32.mrf.mxu2  ;;  %v604_v63 = vpop.f32.mrf.mxu3 }
  0xce   :  { %864 = vst [vmem:[%s1448_s2 + $0x128] sm:$0xff] %v564_v62  ;;  %v487_v0 = vpop.f32.mrf.mxu0  ;;  %v527_v1 = vpop.f32.mrf.mxu1 }
  0xcf   :  { %880 = vst [vmem:[%s1448_s2 + $0x1a8] sm:$0xff] %v604_v63 }
  0xd0   :  { %833 = vst [vmem:[%s1448_s2 + $0x30] sm:$0xff] %v487_v0 }
  0xd1   :  { %849 = vst [vmem:[%s1448_s2 + $0xb0] sm:$0xff] %v527_v1 }
  0xd5   :  { %v567_v2 = vpop.f32.mrf.mxu2  ;;  %v607_v3 = vpop.f32.mrf.mxu3 }
  0xd6   :  { %865 = vst [vmem:[%s1448_s2 + $0x130] sm:$0xff] %v567_v2  ;;  %v489_v4 = vpop.f32.mrf.mxu0  ;;  %v529_v5 = vpop.f32.mrf.mxu1 }
  0xd7   :  { %881 = vst [vmem:[%s1448_s2 + $0x1b0] sm:$0xff] %v607_v3 }
  0xd8   :  { %834 = vst [vmem:[%s1448_s2 + $0x38] sm:$0xff] %v489_v4 }
  0xd9   :  { %850 = vst [vmem:[%s1448_s2 + $0xb8] sm:$0xff] %v529_v5 }
  0xdd   :  { %v569_v6 = vpop.f32.mrf.mxu2  ;;  %v609_v7 = vpop.f32.mrf.mxu3 }
  0xde   :  { %866 = vst [vmem:[%s1448_s2 + $0x138] sm:$0xff] %v569_v6  ;;  %v492_v8 = vpop.f32.mrf.mxu0  ;;  %v532_v9 = vpop.f32.mrf.mxu1 }
  0xdf   :  { %882 = vst [vmem:[%s1448_s2 + $0x1b8] sm:$0xff] %v609_v7 }
  0xe0   :  { %835 = vst [vmem:[%s1448_s2 + $0x40] sm:$0xff] %v492_v8 }
  0xe1   :  { %851 = vst [vmem:[%s1448_s2 + $0xc0] sm:$0xff] %v532_v9 }
  0xe5   :  { %v572_v10 = vpop.f32.mrf.mxu2  ;;  %v612_v11 = vpop.f32.mrf.mxu3 }
  0xe6   :  { %867 = vst [vmem:[%s1448_s2 + $0x140] sm:$0xff] %v572_v10  ;;  %v494_v12 = vpop.f32.mrf.mxu0  ;;  %v534_v13 = vpop.f32.mrf.mxu1 }
  0xe7   :  { %883 = vst [vmem:[%s1448_s2 + $0x1c0] sm:$0xff] %v612_v11 }
  0xe8   :  { %836 = vst [vmem:[%s1448_s2 + $0x48] sm:$0xff] %v494_v12 }
  0xe9   :  { %852 = vst [vmem:[%s1448_s2 + $0xc8] sm:$0xff] %v534_v13 }
  0xed   :  { %v574_v14 = vpop.f32.mrf.mxu2  ;;  %v614_v15 = vpop.f32.mrf.mxu3 }
  0xee   :  { %868 = vst [vmem:[%s1448_s2 + $0x148] sm:$0xff] %v574_v14  ;;  %v497_v16 = vpop.f32.mrf.mxu0  ;;  %v537_v17 = vpop.f32.mrf.mxu1 }
  0xef   :  { %884 = vst [vmem:[%s1448_s2 + $0x1c8] sm:$0xff] %v614_v15 }
  0xf0   :  { %837 = vst [vmem:[%s1448_s2 + $0x50] sm:$0xff] %v497_v16 }
  0xf1   :  { %853 = vst [vmem:[%s1448_s2 + $0xd0] sm:$0xff] %v537_v17 }
  0xf5   :  { %v577_v18 = vpop.f32.mrf.mxu2  ;;  %v617_v19 = vpop.f32.mrf.mxu3 }
  0xf6   :  { %869 = vst [vmem:[%s1448_s2 + $0x150] sm:$0xff] %v577_v18  ;;  %v499_v20 = vpop.f32.mrf.mxu0  ;;  %v539_v21 = vpop.f32.mrf.mxu1 }
  0xf7   :  { %885 = vst [vmem:[%s1448_s2 + $0x1d0] sm:$0xff] %v617_v19 }
  0xf8   :  { %838 = vst [vmem:[%s1448_s2 + $0x58] sm:$0xff] %v499_v20 }
  0xf9   :  { %854 = vst [vmem:[%s1448_s2 + $0xd8] sm:$0xff] %v539_v21 }
  0xfd   :  { %v579_v22 = vpop.f32.mrf.mxu2  ;;  %v619_v23 = vpop.f32.mrf.mxu3 }
  0xfe   :  { %870 = vst [vmem:[%s1448_s2 + $0x158] sm:$0xff] %v579_v22  ;;  %v502_v24 = vpop.f32.mrf.mxu0  ;;  %v542_v25 = vpop.f32.mrf.mxu1 }
  0xff   :  { %886 = vst [vmem:[%s1448_s2 + $0x1d8] sm:$0xff] %v619_v23 }
 0x100   :  { %839 = vst [vmem:[%s1448_s2 + $0x60] sm:$0xff] %v502_v24 }
 0x101   :  { %855 = vst [vmem:[%s1448_s2 + $0xe0] sm:$0xff] %v542_v25 }
 0x105   :  { %v582_v26 = vpop.f32.mrf.mxu2  ;;  %v622_v27 = vpop.f32.mrf.mxu3 }
 0x106   :  { %871 = vst [vmem:[%s1448_s2 + $0x160] sm:$0xff] %v582_v26  ;;  %v504_v28 = vpop.f32.mrf.mxu0  ;;  %v544_v29 = vpop.f32.mrf.mxu1 }
 0x107   :  { %887 = vst [vmem:[%s1448_s2 + $0x1e0] sm:$0xff] %v622_v27 }
 0x108   :  { %840 = vst [vmem:[%s1448_s2 + $0x68] sm:$0xff] %v504_v28 }
 0x109   :  { %856 = vst [vmem:[%s1448_s2 + $0xe8] sm:$0xff] %v544_v29 }
 0x10d   :  { %v584_v30 = vpop.f32.mrf.mxu2  ;;  %v624_v31 = vpop.f32.mrf.mxu3 }
 0x10e   :  { %872 = vst [vmem:[%s1448_s2 + $0x168] sm:$0xff] %v584_v30  ;;  %v507_v32 = vpop.f32.mrf.mxu0  ;;  %v547_v33 = vpop.f32.mrf.mxu1 }
 0x10f   :  { %888 = vst [vmem:[%s1448_s2 + $0x1e8] sm:$0xff] %v624_v31 }
 0x110   :  { %841 = vst [vmem:[%s1448_s2 + $0x70] sm:$0xff] %v507_v32 }
 0x111   :  { %857 = vst [vmem:[%s1448_s2 + $0xf0] sm:$0xff] %v547_v33 }
 0x115   :  { %v587_v34 = vpop.f32.mrf.mxu2  ;;  %v627_v35 = vpop.f32.mrf.mxu3 }
 0x116   :  { %873 = vst [vmem:[%s1448_s2 + $0x170] sm:$0xff] %v587_v34  ;;  %v509_v36 = vpop.f32.mrf.mxu0  ;;  %v549_v37 = vpop.f32.mrf.mxu1 }
 0x117   :  { %889 = vst [vmem:[%s1448_s2 + $0x1f0] sm:$0xff] %v627_v35 }
 0x118   :  { %842 = vst [vmem:[%s1448_s2 + $0x78] sm:$0xff] %v509_v36 }
 0x119   :  { %858 = vst [vmem:[%s1448_s2 + $0xf8] sm:$0xff] %v549_v37 }
 0x11d   :  { %v589_v38 = vpop.f32.mrf.mxu2  ;;  %v629_v39 = vpop.f32.mrf.mxu3 }
 0x11e   :  { %874 = vst [vmem:[%s1448_s2 + $0x178] sm:$0xff] %v589_v38 }
 0x11f   :  { %890 = vst [vmem:[%s1448_s2 + $0x1f8] sm:$0xff] %v629_v39 }

</bundles_post_ra>
